<compile_context>
chip_gen: v6e
topology: v6e:2x2x1
jax: 0.10.0
libtpu: 0.0.40
codegen_flags: <defaults>
</compile_context>

<pallas_src>
import numpy as np
import jax
import jax.numpy as jnp
from jax.experimental import pallas as pl
from jax.experimental.pallas import tpu as pltpu

POOL_K = 5
POOL_S = 2
POOL_OUT = 4                      # (11 - 5) // 2 + 1
N_SPATIAL = POOL_OUT * POOL_OUT   # 16
CONV_OUT = 32
FC1_OUT = 100
FC2_OUT = 10
LANE = 128                        # lane-dense padding target
NEG_BIG = -1.0e30                 # mask value for padded logits
TB_MAX = 256                      # batch tile (v7x-safe; ~0.7 MiB/tile total)


def side_block_kernel(taps_ref, wcomb_ref, b1_ref, w2_ref, b2_ref, out_ref):
    # --- finish the max-pool: tree-reduce the 5 H-taps (W already pooled).
    #     taps: (5, TB, KDIM) bf16, taps[di, n, (i*4+j)*C + c] = max_dj x[n,c,2i+di,2j+dj]
    t01 = jnp.maximum(taps_ref[0], taps_ref[1])
    t23 = jnp.maximum(taps_ref[2], taps_ref[3])
    pooled = jnp.maximum(jnp.maximum(t01, t23), taps_ref[4])        # (TB, KDIM) bf16

    # --- fused 1x1-conv + NCHW-flatten + fc1 (K padded to 128, out 100 -> 128).
    h1 = jnp.dot(pooled, wcomb_ref[...],
                 preferred_element_type=jnp.float32) + b1_ref[...]  # (TB, 128) f32

    # --- fc2 (out 10 -> 128; padded logits carry a -1e30 bias).
    h2 = jnp.dot(h1.astype(jnp.bfloat16), w2_ref[...],
                 preferred_element_type=jnp.float32) + b2_ref[...]  # (TB, 128) f32

    # --- log_softmax over the lane dim.  exp(-1e30 - m) underflows to exactly 0,
    #     so the 118 padded lanes do not perturb the logsumexp.
    m = jnp.max(h2, axis=1, keepdims=True)
    z = h2 - m
    lse = jnp.log(jnp.sum(jnp.exp(z), axis=1, keepdims=True))
    out_ref[...] = z - lse


def prepare_params(params):
    """One-time folding/padding of the PyTorch-layout parameters.

    Folds 1x1-conv + NCHW flatten + fc1 into a single matmul:
      W_comb[s*C + c, j] = sum_k conv_w[k, c] * fc1_w[j, k*16 + s]
      b1_eff[j]          = fc1_b[j] + sum_{k,s} conv_b[k] * fc1_w[j, k*16 + s]
    and pads everything lane-dense (contraction 16*C -> KDIM, outputs -> 128).
    """
    cw, cb, w1, b1, w2, b2 = params
    C = cw.shape[1]
    kdim_raw = N_SPATIAL * C
    kdim = max(LANE, ((kdim_raw + LANE - 1) // LANE) * LANE)

    w1_r = w1.reshape(FC1_OUT, CONV_OUT, N_SPATIAL)                  # w1_r[j, k, s]
    w_comb = jnp.einsum('kc,jks->scj', cw, w1_r).reshape(kdim_raw, FC1_OUT)
    b1_eff = b1 + jnp.einsum('k,jks->j', cb, w1_r)                   # (100,)

    w_comb_p = jnp.zeros((kdim, LANE), jnp.bfloat16)
    w_comb_p = w_comb_p.at[:kdim_raw, :FC1_OUT].set(w_comb.astype(jnp.bfloat16))
    b1_p = jnp.zeros((1, LANE), jnp.float32).at[:, :FC1_OUT].set(b1_eff)
    w2_p = jnp.zeros((LANE, LANE), jnp.bfloat16)
    w2_p = w2_p.at[:FC1_OUT, :FC2_OUT].set(w2.T.astype(jnp.bfloat16))
    b2_p = jnp.full((1, LANE), NEG_BIG, jnp.float32).at[:, :FC2_OUT].set(b2)
    return (w_comb_p, b1_p, w2_p, b2_p)


def side_block_forward(x, prepared):
    """x: (N, C, 11, 11) float32, NCHW.  prepared = prepare_params(params)."""
    w_comb_p, b1_p, w2_p, b2_p = prepared
    N, C, H, W = x.shape
    assert H == 11 and W == 11, "SideBlock's fc1(512) requires 11x11 spatial input"
    kdim_raw = N_SPATIAL * C
    kdim = w_comb_p.shape[0]

    # ---- separable max-pool, W axis in the wrapper (bf16, 5 strided slices).
    x_nhwc = jnp.transpose(x, (0, 2, 3, 1)).astype(jnp.bfloat16)     # (N, 11, 11, C)
    span = POOL_S * (POOL_OUT - 1) + 1                               # 7
    w_slices = [x_nhwc[:, :, dj:dj + span:POOL_S, :] for dj in range(POOL_K)]
    xw = jnp.maximum(jnp.maximum(jnp.maximum(w_slices[0], w_slices[1]),
                                 jnp.maximum(w_slices[2], w_slices[3])),
                     w_slices[4])                                    # (N, 11, 4, C)

    # ---- gather the 5 H-taps; taps[di][n, (i*4+j)*C + c] = xw[n, 2i+di, j, c]
    taps = jnp.stack(
        [xw[:, di:di + span:POOL_S, :, :].reshape(N, kdim_raw) for di in range(POOL_K)],
        axis=0)                                                      # (5, N, 16*C) bf16

    # ---- batch tile + lane-dense padding of the contraction dim.
    TB = TB_MAX if N > TB_MAX else ((N + 15) // 16) * 16             # bf16 sublane = 16
    n_pad = ((N + TB - 1) // TB) * TB
    taps = jnp.pad(taps, ((0, 0), (0, n_pad - N), (0, kdim - kdim_raw)))

    out_padded = pl.pallas_call(
        side_block_kernel,
        out_shape=jax.ShapeDtypeStruct((n_pad, LANE), jnp.float32),
        grid=(n_pad // TB,),
        in_specs=[
            pl.BlockSpec((POOL_K, TB, kdim), lambda b: (0, b, 0)),   # taps: tile batch
            pl.BlockSpec((kdim, LANE), lambda b: (0, 0)),            # weights stay resident
            pl.BlockSpec((1, LANE), lambda b: (0, 0)),
            pl.BlockSpec((LANE, LANE), lambda b: (0, 0)),
            pl.BlockSpec((1, LANE), lambda b: (0, 0)),
        ],
        out_specs=pl.BlockSpec((TB, LANE), lambda b: (b, 0)),
        compiler_params=pltpu.CompilerParams(
            dimension_semantics=("parallel",)),                      # 2 TCs on v7x
    )(taps, w_comb_p, b1_p, w2_p, b2_p)

    # TODO(synk): if the consumer tolerates the padded (N,128) buffer, drop this slice.
    return out_padded[:N, :FC2_OUT]                                  # (N, 10)


def reference_forward(x, params):
    """Pure-JAX f32 mirror of the PyTorch forward (NCHW semantics)."""
    cw, cb, w1, b1, w2, b2 = params
    N = x.shape[0]
    pooled = jnp.stack([
        jnp.stack([
            jnp.max(x[:, :, POOL_S * i:POOL_S * i + POOL_K,
                          POOL_S * j:POOL_S * j + POOL_K], axis=(2, 3))
            for j in range(POOL_OUT)], axis=-1)
        for i in range(POOL_OUT)], axis=-2)                          # (N, C, 4, 4)
    conv = jnp.einsum('kc,nchw->nkhw', cw, pooled) + cb[None, :, None, None]
    flat = conv.reshape(N, -1)                                       # NCHW flatten -> (N, 512)
    h1 = flat @ w1.T + b1
    h2 = h1 @ w2.T + b2
    return jax.nn.log_softmax(h2, axis=1)


if __name__ == "__main__":
    key = jax.random.PRNGKey(0)
    k_x, k_cw, k_cb, k_w1, k_b1, k_w2, k_b2 = jax.random.split(key, 7)

    N, C = 2, 4                                   # batch=2, in_channels=4
    x = jax.random.normal(k_x, (N, C, 11, 11), dtype=jnp.float32)

    # deterministic synthetic parameters (PyTorch shapes)
    cw = 0.1 * jax.random.normal(k_cw, (CONV_OUT, C), dtype=jnp.float32)       # conv1.weight[:, :, 0, 0]
    cb = 0.1 * jax.random.normal(k_cb, (CONV_OUT,), dtype=jnp.float32)
    w1 = 0.05 * jax.random.normal(k_w1, (FC1_OUT, 512), dtype=jnp.float32)     # fc1.weight
    b1 = 0.05 * jax.random.normal(k_b1, (FC1_OUT,), dtype=jnp.float32)
    w2 = 0.1 * jax.random.normal(k_w2, (FC2_OUT, FC1_OUT), dtype=jnp.float32)  # fc2.weight
    b2 = 0.1 * jax.random.normal(k_b2, (FC2_OUT,), dtype=jnp.float32)
    params = (cw, cb, w1, b1, w2, b2)

    prepared = jax.tree_util.tree_map(jax.block_until_ready, prepare_params(params))

    out = side_block_forward(x, prepared)
    out = jax.block_until_ready(out)

    ref = reference_forward(x, params)
    # bf16 cast of the input before pooling + bf16 MXU operands (f32 accumulation)
    # -> expected quantization error, hence the loosened tolerance.
    np.testing.assert_allclose(np.asarray(out), np.asarray(ref), rtol=5e-2, atol=5e-2)

    print("KERNEL_OK")
</pallas_src>

<mosaic_0001>
module attributes {stable_mosaic.version = 11 : i64} {
  func.func @side_block_kernel(%arg0: i32, %arg1: memref<5x16x128xbf16, #tpu.memory_space<vmem>>, %arg2: memref<128x128xbf16, #tpu.memory_space<vmem>>, %arg3: memref<1x128xf32, #tpu.memory_space<vmem>>, %arg4: memref<128x128xbf16, #tpu.memory_space<vmem>>, %arg5: memref<1x128xf32, #tpu.memory_space<vmem>>, %arg6: memref<16x128xf32, #tpu.memory_space<vmem>>) attributes {dimension_semantics = [#tpu.dimension_semantics<parallel>], iteration_bounds = array<i64: 1>, scalar_prefetch = 0 : i64, scratch_operands = 0 : i64, tpu.core_type = #tpu.core_type<tc>, window_params = [{transform_indices = @transform_0, window_bounds = array<i64: 5, 16, 128>}, {pipeline_mode = #tpu.pipeline_mode<synchronous>, transform_indices = @transform_1, window_bounds = array<i64: 128, 128>}, {pipeline_mode = #tpu.pipeline_mode<synchronous>, transform_indices = @transform_2, window_bounds = array<i64: 1, 128>}, {pipeline_mode = #tpu.pipeline_mode<synchronous>, transform_indices = @transform_3, window_bounds = array<i64: 128, 128>}, {pipeline_mode = #tpu.pipeline_mode<synchronous>, transform_indices = @transform_4, window_bounds = array<i64: 1, 128>}, {transform_indices = @transform_5, window_bounds = array<i64: 16, 128>}]} {
    %c0 = arith.constant 0 : index
    %c0_0 = arith.constant 0 : index
    %c0_1 = arith.constant 0 : index
    %0 = vector.load %arg1[%c0, %c0_0, %c0_1] : memref<5x16x128xbf16, #tpu.memory_space<vmem>>, vector<1x16x128xbf16>
    %1 = vector.shape_cast %0 : vector<1x16x128xbf16> to vector<16x128xbf16>
    %c1 = arith.constant 1 : index
    %c0_2 = arith.constant 0 : index
    %c0_3 = arith.constant 0 : index
    %2 = vector.load %arg1[%c1, %c0_2, %c0_3] : memref<5x16x128xbf16, #tpu.memory_space<vmem>>, vector<1x16x128xbf16>
    %3 = vector.shape_cast %2 : vector<1x16x128xbf16> to vector<16x128xbf16>
    %4 = arith.maximumf %1, %3 : vector<16x128xbf16>
    %c2 = arith.constant 2 : index
    %c0_4 = arith.constant 0 : index
    %c0_5 = arith.constant 0 : index
    %5 = vector.load %arg1[%c2, %c0_4, %c0_5] : memref<5x16x128xbf16, #tpu.memory_space<vmem>>, vector<1x16x128xbf16>
    %6 = vector.shape_cast %5 : vector<1x16x128xbf16> to vector<16x128xbf16>
    %c3 = arith.constant 3 : index
    %c0_6 = arith.constant 0 : index
    %c0_7 = arith.constant 0 : index
    %7 = vector.load %arg1[%c3, %c0_6, %c0_7] : memref<5x16x128xbf16, #tpu.memory_space<vmem>>, vector<1x16x128xbf16>
    %8 = vector.shape_cast %7 : vector<1x16x128xbf16> to vector<16x128xbf16>
    %9 = arith.maximumf %6, %8 : vector<16x128xbf16>
    %10 = arith.maximumf %4, %9 : vector<16x128xbf16>
    %c4 = arith.constant 4 : index
    %c0_8 = arith.constant 0 : index
    %c0_9 = arith.constant 0 : index
    %11 = vector.load %arg1[%c4, %c0_8, %c0_9] : memref<5x16x128xbf16, #tpu.memory_space<vmem>>, vector<1x16x128xbf16>
    %12 = vector.shape_cast %11 : vector<1x16x128xbf16> to vector<16x128xbf16>
    %13 = arith.maximumf %10, %12 : vector<16x128xbf16>
    %c0_10 = arith.constant 0 : index
    %c0_11 = arith.constant 0 : index
    %14 = vector.load %arg2[%c0_10, %c0_11] : memref<128x128xbf16, #tpu.memory_space<vmem>>, vector<128x128xbf16>
    %cst = arith.constant dense<0.000000e+00> : vector<16x128xf32>
    %15 = tpu.matmul %13, %14, %cst {dimension_numbers = #tpu.dot_dimension_numbers<[1], [0], [0], [1], [0, 0, 1, 1], [], []>} : vector<16x128xbf16>, vector<128x128xbf16>, vector<16x128xf32> -> vector<16x128xf32>
    %c0_12 = arith.constant 0 : index
    %c0_13 = arith.constant 0 : index
    %16 = vector.load %arg3[%c0_12, %c0_13] : memref<1x128xf32, #tpu.memory_space<vmem>>, vector<1x128xf32>
    %17 = vector.broadcast %16 : vector<1x128xf32> to vector<16x128xf32>
    %18 = arith.addf %15, %17 : vector<16x128xf32>
    %19 = arith.truncf %18 : vector<16x128xf32> to vector<16x128xbf16>
    %c0_14 = arith.constant 0 : index
    %c0_15 = arith.constant 0 : index
    %20 = vector.load %arg4[%c0_14, %c0_15] : memref<128x128xbf16, #tpu.memory_space<vmem>>, vector<128x128xbf16>
    %cst_16 = arith.constant dense<0.000000e+00> : vector<16x128xf32>
    %21 = tpu.matmul %19, %20, %cst_16 {dimension_numbers = #tpu.dot_dimension_numbers<[1], [0], [0], [1], [0, 0, 1, 1], [], []>} : vector<16x128xbf16>, vector<128x128xbf16>, vector<16x128xf32> -> vector<16x128xf32>
    %c0_17 = arith.constant 0 : index
    %c0_18 = arith.constant 0 : index
    %22 = vector.load %arg5[%c0_17, %c0_18] : memref<1x128xf32, #tpu.memory_space<vmem>>, vector<1x128xf32>
    %23 = vector.broadcast %22 : vector<1x128xf32> to vector<16x128xf32>
    %24 = arith.addf %21, %23 : vector<16x128xf32>
    %cst_19 = arith.constant dense<0xFF800000> : vector<16xf32>
    %25 = vector.multi_reduction <maximumf>, %24, %cst_19 [1] : vector<16x128xf32> to vector<16xf32>
    %26 = vector.shape_cast %25 : vector<16xf32> to vector<16x1xf32>
    %27 = vector.broadcast %26 : vector<16x1xf32> to vector<16x128xf32>
    %28 = arith.subf %24, %27 : vector<16x128xf32>
    %29 = math.exp %28 : vector<16x128xf32>
    %cst_20 = arith.constant dense<0.000000e+00> : vector<16xf32>
    %30 = vector.multi_reduction <add>, %29, %cst_20 [1] : vector<16x128xf32> to vector<16xf32>
    %31 = vector.shape_cast %30 : vector<16xf32> to vector<16x1xf32>
    %32 = math.log %31 : vector<16x1xf32>
    %33 = vector.broadcast %32 : vector<16x1xf32> to vector<16x128xf32>
    %34 = arith.subf %28, %33 : vector<16x128xf32>
    %c0_21 = arith.constant 0 : index
    %c0_22 = arith.constant 0 : index
    %35 = vector.load %arg6[%c0_21, %c0_22] : memref<16x128xf32, #tpu.memory_space<vmem>>, vector<16x128xf32>
    tpu.vector_store %arg6[%c0_21, %c0_22], %34 {strides = array<i32>} : memref<16x128xf32, #tpu.memory_space<vmem>>, vector<16x128xf32>,
    return
  }
  func.func @transform_0(%arg0: i32) -> (i32, i32, i32) {
    %c0_i32 = arith.constant 0 : i32
    %c0_i32_0 = arith.constant 0 : i32
    %c0_i32_1 = arith.constant 0 : i32
    return %c0_i32, %arg0, %c0_i32_0 : i32, i32, i32
  }
  func.func @transform_1(%arg0: i32) -> (i32, i32) {
    %c0_i32 = arith.constant 0 : i32
    %c0_i32_0 = arith.constant 0 : i32
    %c0_i32_1 = arith.constant 0 : i32
    return %c0_i32, %c0_i32_0 : i32, i32
  }
  func.func @transform_2(%arg0: i32) -> (i32, i32) {
    %c0_i32 = arith.constant 0 : i32
    %c0_i32_0 = arith.constant 0 : i32
    %c0_i32_1 = arith.constant 0 : i32
    return %c0_i32, %c0_i32_0 : i32, i32
  }
  func.func @transform_3(%arg0: i32) -> (i32, i32) {
    %c0_i32 = arith.constant 0 : i32
    %c0_i32_0 = arith.constant 0 : i32
    %c0_i32_1 = arith.constant 0 : i32
    return %c0_i32, %c0_i32_0 : i32, i32
  }
  func.func @transform_4(%arg0: i32) -> (i32, i32) {
    %c0_i32 = arith.constant 0 : i32
    %c0_i32_0 = arith.constant 0 : i32
    %c0_i32_1 = arith.constant 0 : i32
    return %c0_i32, %c0_i32_0 : i32, i32
  }
  func.func @transform_5(%arg0: i32) -> (i32, i32) {
    %c0_i32 = arith.constant 0 : i32
    %c0_i32_0 = arith.constant 0 : i32
    return %arg0, %c0_i32 : i32, i32
  }
}

</mosaic_0001>

<bundles_post_ra>
// kernel: tpu_custom_call.1
= control target key start
LH: loop header
LB: loop body
LE: loop exit
PB: predicated region body
PF: predicated region fallthrough
CT: control target
= control target key end

     0   :  { %10 = vsyncpa [#allocation3], 0  ;;  %s629_s0 = inlined_call_operand.hbm [shape: bf16[5,16,128], index: 0, kind: input, shape index: {}]   ;;  %s630_s1 = inlined_call_operand.hbm [shape: bf16[128,128], index: 1, kind: input, shape index: {}]   ;;  %s631_s2 = inlined_call_operand.vmem [shape: f32[1,128], index: 2, kind: input, shape index: {}]   ;;  %s632_s3 = inlined_call_operand.hbm [shape: bf16[128,128], index: 3, kind: input, shape index: {}]   ;;  %s633_s4 = inlined_call_operand.vmem [shape: f32[1,128], index: 4, kind: input, shape index: {}]   ;;  %s634_s5 = inlined_call_operand.hbm [shape: f32[16,128], index: 5, kind: output, shape index: {}]  }
   0x1   :  { %11 = vsyncpa [#allocation6], 0 }
   0x2   :  { %12 = vsyncpa [#allocation4], 0  ;;  %s553_s18 = smov [#allocation5]   ;;  %s554_s20 = smov [#allocation2]  }
   0x3   :  { %s30_s19 = sshll.u32 %s553_s18, 4  ;;  %s18_s21 = sshll.u32 %s554_s20, 4  ;;  %s31_s19 = int_to_ptr.vmem [resolvable:$true] %s30_s19  ;;  %s19_s21 = int_to_ptr.vmem [resolvable:$true] %s18_s21 }
   0x4   :  { %s475_s22 = scalar_lea.vmem %s31_s19, 1024  ;;  %p480_p1 = scmp.lt.s32.totalorder %s31_s19, %s31_s19 }
   0x5   :  { %p476_p0 = scmp.ne.s32.totalorder %s31_s19, %s475_s22  ;;  %p481_p2 = scmp.lt.s32.totalorder %s475_s22, %s475_s22 }
   0x7   :  { %p482_p3 = por %p481_p2, %p480_p1 }
   0x9   :  { %p483_p4 = pnand %p482_p3, %p476_p0 }
   0xb   :  { %486 = shalt.err (!%p483_p4)
}
   0xc   :  { %s555_s23 = smov 64   ;;  %s556_s24 = smov 4  }
   0xd   :  { %36 = dma.hbm_to_vmem [thread:$0]  %s630_s1, 1024, %s31_s19, [#allocation6], %s555_s23, %s555_s23, %s556_s24  }
   0xe   :  { %s495_s27 = scalar_lea.vmem %s19_s21, 640  ;;  %p500_p6 = scmp.lt.s32.totalorder %s19_s21, %s19_s21 }
   0xf   :  { %p496_p5 = scmp.ne.s32.totalorder %s19_s21, %s495_s27  ;;  %p501_p7 = scmp.lt.s32.totalorder %s495_s27, %s495_s27 }
  0x11   :  { %p502_p8 = por %p501_p7, %p500_p6 }
  0x13   :  { %p503_p9 = pnand %p502_p8, %p496_p5 }
  0x15   :  { %506 = shalt.err (!%p503_p9)
}
  0x16   :  { %24 = dma.hbm_to_vmem [thread:$0]  %s629_s0, 640, %s19_s21, [#allocation3], %s555_s23, %s555_s23, %s556_s24  }
  0x17   :  { %s557_s30 = smov [#allocation7]  }
  0x18   :  { %s44_s6 = sshll.u32 %s557_s30, 4  ;;  %s45_s6 = int_to_ptr.vmem [resolvable:$true] %s44_s6 }
  0x19   :  { %s515_s7 = scalar_lea.vmem %s45_s6, 1024  ;;  %p520_p11 = scmp.lt.s32.totalorder %s45_s6, %s45_s6 }
  0x1a   :  { %p516_p10 = scmp.ne.s32.totalorder %s45_s6, %s515_s7  ;;  %p521_p12 = scmp.lt.s32.totalorder %s515_s7, %s515_s7 }
  0x1c   :  { %p522_p13 = por %p521_p12, %p520_p11 }
  0x1e   :  { %p523_p0 = pnand %p522_p13, %p516_p10 }
  0x20   :  { %526 = shalt.err (!%p523_p0)
}
  0x21   :  { %50 = dma.hbm_to_vmem [thread:$0]  %s632_s3, 1024, %s45_s6, [#allocation6], %s555_s23, %s555_s23, %s556_s24  }
  0x22   :  { %547 = dma.done.wait [#allocation3], 640  }
  0x23   :  { %548 = vsyncadd [#allocation3], 4294966656 }
  0x24   :  { %549 = dma.done.wait [#allocation6], 2048  }
  0x25   :  { %550 = vsyncadd [#allocation6], 4294965248  ;;  %v558_v0 = vmov 0.0   ;;  %vm559_vm0 = vmmov 0   ;;  %v443_v1 = vld [vmem:[#allocation5 + $0x38] sm:$0xff]   ;;  %v444_v2 = vld [vmem:[#allocation5 + $0x30] sm:$0xff]  }
  0x26   :  { %393 = vmatprep.subr.bf16.mxu0 %v558_v0  ;;  %409 = vmatprep.mubr.msk.bf16.mxu0 %vm559_vm0, %v558_v0  ;;  %v445_v3 = vld [vmem:[#allocation5 + $0x28] sm:$0xff]   ;;  %v446_v4 = vld [vmem:[#allocation5 + $0x20] sm:$0xff]   ;;  %v447_v5 = vld [vmem:[#allocation5 + $0x18] sm:$0xff]  }
  0x27   :  { %413 = vmatprep.subr.bf16.mxu1 %v558_v0  ;;  %429 = vmatprep.mubr.msk.bf16.mxu1 %vm559_vm0, %v558_v0  ;;  %v63_v6 = vld [vmem:[#allocation2] sm:$0xf]  ;;  %v64_v7 = vld [vmem:[#allocation2 + $0x4] sm:$0xf]  ;;  %v66_v8 = vld [vmem:[#allocation2 + $0x8] sm:$0xf] }
  0x28   :  { %394 = vmatpush3.bf16.msra.mxu0 %v443_v1  ;;  %v67_v9 = vld [vmem:[#allocation2 + $0xc] sm:$0xf]  ;;  %v71_v10 = vld [vmem:[#allocation2 + $0x10] sm:$0xf]  ;;  %v72_v11 = vld [vmem:[#allocation2 + $0x14] sm:$0xf]  ;;  %v68_v17 = vmax.bf16 %v66_v8, %v63_v6 }
  0x29   :  { %395 = vmatprep.subr.bf16.mxu0 %v558_v0  ;;  %v74_v12 = vld [vmem:[#allocation2 + $0x18] sm:$0xf]  ;;  %v451_v13 = vld [vmem:[#allocation7 + $0x38] sm:$0xff]   ;;  %v75_v14 = vld [vmem:[#allocation2 + $0x1c] sm:$0xf]  ;;  %v69_v18 = vmax.bf16 %v67_v9, %v64_v7 }
  0x2a   :  { %414 = vmatpush3.bf16.msra.mxu1 %v451_v13  ;;  %v452_v15 = vld [vmem:[#allocation7 + $0x30] sm:$0xff]   ;;  %v76_v19 = vmax.bf16 %v74_v12, %v71_v10  ;;  %v77_v20 = vmax.bf16 %v75_v14, %v72_v11  ;;  %v453_v21 = vld [vmem:[#allocation7 + $0x28] sm:$0xff]   ;;  %v81_v25 = vld [vmem:[#allocation2 + $0x20] sm:$0xf] }
  0x2b   :  { %415 = vmatprep.subr.bf16.mxu1 %v558_v0  ;;  %v448_v16 = vld [vmem:[#allocation5 + $0x10] sm:$0xff]   ;;  %v449_v22 = vld [vmem:[#allocation5 + $0x8] sm:$0xff]   ;;  %v82_v26 = vld [vmem:[#allocation2 + $0x24] sm:$0xf] }
  0x2c   :  { %396 = vmatpush3.bf16.msra.mxu0 %v444_v2  ;;  %v78_v23 = vmax.bf16 %v76_v19, %v68_v17  ;;  %v79_v24 = vmax.bf16 %v77_v20, %v69_v18  ;;  %v454_v27 = vld [vmem:[#allocation7 + $0x20] sm:$0xff]   ;;  %v455_v31 = vld [vmem:[#allocation7 + $0x18] sm:$0xff]   ;;  %v456_v33 = vld [vmem:[#allocation7 + $0x10] sm:$0xff]  }
  0x2d   :  { %397 = vmatprep.subr.bf16.mxu0 %v558_v0  ;;  %v450_v30 = vld [vmem:[#allocation5] sm:$0xff]   ;;  %v457_v34 = vld [vmem:[#allocation7 + $0x8] sm:$0xff]   ;;  %v356_v37 = vld [vmem:[%s631_s2] ss:$0 sm:$0xff]  ;;  %s560_s2 = smov [#allocation8]  }
  0x2e   :  { %416 = vmatpush3.bf16.msra.mxu1 %v452_v15  ;;  %v83_v28 = vmax.bf16 %v81_v25, %v78_v23  ;;  %v84_v29 = vmax.bf16 %v82_v26, %v79_v24  ;;  %v458_v35 = vld [vmem:[#allocation7] sm:$0xff]   ;;  %v366_v44 = vld [vmem:[%s633_s4] ss:$0 sm:$0xff]  ;;  %s343_s4 = sshll.u32 %s560_s2, 4  ;;  %s344_s4 = int_to_ptr.vmem [resolvable:$true] %s343_s4 }
  0x2f   :  { %417 = vmatprep.subr.bf16.mxu1 %v558_v0  ;;  %s527_s11 = scalar_lea.vmem %s344_s4, 256  ;;  %p532_p2 = scmp.lt.s32.totalorder %s344_s4, %s344_s4 }
  0x30   :  { %398 = vmatpush3.bf16.msra.mxu0 %v445_v3  ;;  %v357_v32 = vcombine.low %v83_v28, %v84_v29  ;;  %p528_p1 = scmp.ne.s32.totalorder %s344_s4, %s527_s11  ;;  %p533_p3 = scmp.lt.s32.totalorder %s527_s11, %s527_s11 }
  0x31   :  { %399 = vmatprep.subr.bf16.mxu0 %v558_v0 }
  0x32   :  { %418 = vmatpush3.bf16.msra.mxu1 %v453_v21  ;;  %p534_p4 = por %p533_p3, %p532_p2 }
  0x33   :  { %419 = vmatprep.subr.bf16.mxu1 %v558_v0 }
  0x34   :  { %400 = vmatpush3.bf16.msra.mxu0 %v446_v4  ;;  %p535_p5 = pnand %p534_p4, %p528_p1 }
  0x35   :  { %401 = vmatprep.subr.bf16.mxu0 %v558_v0 }
  0x36   :  { %420 = vmatpush3.bf16.msra.mxu1 %v454_v27 }
  0x37   :  { %421 = vmatprep.subr.bf16.mxu1 %v558_v0 }
  0x38   :  { %402 = vmatpush3.bf16.msra.mxu0 %v447_v5 }
  0x39   :  { %403 = vmatprep.subr.bf16.mxu0 %v558_v0 }
  0x3a   :  { %422 = vmatpush3.bf16.msra.mxu1 %v455_v31 }
  0x3b   :  { %423 = vmatprep.subr.bf16.mxu1 %v558_v0 }
  0x3c   :  { %404 = vmatpush3.bf16.msra.mxu0 %v448_v16 }
  0x3d   :  { %405 = vmatprep.subr.bf16.mxu0 %v558_v0 }
  0x3e   :  { %424 = vmatpush3.bf16.msra.mxu1 %v456_v33 }
  0x3f   :  { %425 = vmatprep.subr.bf16.mxu1 %v558_v0 }
  0x40   :  { %406 = vmatpush3.bf16.msra.mxu0 %v449_v22 }
  0x41   :  { %407 = vmatprep.subr.bf16.mxu0 %v558_v0 }
  0x42   :  { %426 = vmatpush3.bf16.msra.mxu1 %v457_v34 }
  0x43   :  { %427 = vmatprep.subr.bf16.mxu1 %v558_v0 }
  0x44   :  { %408 = vmatpush3.bf16.msra.mxu0 %v450_v30 }
  0x46   :  { %428 = vmatpush3.bf16.msra.mxu1 %v458_v35 }
  0x47   :  { %410 = vmatmul.mubr.bf16.vlgmr.msra.gmra.mxu0 %v357_v32 }
 0x107   :  { %v196_v36 = vpop.f32.mrf.mxu0 }
 0x108   :  { %v197_v40 = vadd.f32 %v356_v37, %v196_v36 }
 0x109   :  { %v411_v38 = vpop.f32.mrf.mxu0 }
 0x10b   :  { %v199_v39 = vpop.f32.mrf.mxu0 }
 0x10c   :  { %v200_v41 = vadd.f32 %v356_v37, %v199_v39 }
 0x10d   :  { %v412_v42 = vpop.f32.mrf.mxu0 }
 0x10e   :  { %v203_v43 = vpack.c.bf16 %v200_v41, %v197_v40 }
 0x110   :  { %430 = vmatmul.mubr.bf16.vlgmr.msra.gmra.mxu1 %v203_v43 }
 0x1d0   :  { %v309_v45 = vpop.f32.mrf.mxu1 }
 0x1d1   :  { %v310_v46 = vadd.f32 %v366_v44, %v309_v45 }
 0x1d2   :  { %v431_v47 = vpop.f32.mrf.mxu1 }
 0x1d3   :  { %316 = vmax.xlane.f32.xlu0 %v310_v46 }
 0x1d4   :  { %v312_v48 = vpop.f32.mrf.mxu1 }
 0x1d5   :  { %v313_v49 = vadd.f32 %v366_v44, %v312_v48 }
 0x1d6   :  { %v432_v50 = vpop.f32.mrf.mxu1 }
 0x1d7   :  { %318 = vmax.xlane.f32.xlu0 %v313_v49 }
 0x25c   :  { %v317_v51 = vpop.xlane.xlu0 %316 }
 0x25d   :  { %v320_v52 = vsub.f32 %v310_v46, %v317_v51 }
 0x25f   :  { %v322_v53 = vmul.f32 1.442695, %v320_v52 }
 0x260   :  { %v319_v54 = vpop.xlane.xlu0 %318 }
 0x261   :  { %v321_v55 = vsub.f32 %v313_v49, %v319_v54  ;;  %459 = vpow2.f32 %v322_v53 }
 0x263   :  { %v324_v56 = vmul.f32 1.442695, %v321_v55 }
 0x265   :  { %461 = vpow2.f32 %v324_v56 }
 0x26e   :  { %v460_v57 = vpop.eup %459 }
 0x26f   :  { %326 = vadd.xlane.f32.xlu1 %v460_v57 }
 0x272   :  { %v462_v58 = vpop.eup %461 }
 0x273   :  { %328 = vadd.xlane.f32.xlu1 %v462_v58 }
 0x2f8   :  { %v327_v59 = vpop.xlane.xlu1 %326 }
 0x2f9   :  { %463 = vlog2.f32 %v327_v59 }
 0x2fc   :  { %v329_v60 = vpop.xlane.xlu1 %328 }
 0x2fd   :  { %465 = vlog2.f32 %v329_v60 }
 0x306   :  { %v464_v61 = vpop.eup %463 }
 0x307   :  { %v331_v62 = vmul.f32 0.6931472, %v464_v61 }
 0x309   :  { %v334_v63 = vsub.f32 %v320_v52, %v331_v62 }
 0x30a   :  { %v466_v0 = vpop.eup %465 }
 0x30b   :  { %336 = vst [vmem:[#allocation8] sm:$0xff] %v334_v63  ;;  %v333_v1 = vmul.f32 0.6931472, %v466_v0 }
 0x30d   :  { %v335_v2 = vsub.f32 %v321_v55, %v333_v1 }
 0x30f   :  { %337 = vst [vmem:[#allocation8 + $0x8] sm:$0xff] %v335_v2 }
 0x310   :  { %538 = shalt.err (!%p535_p5)
}
 0x311   :  { %s561_s12 = smov 128   ;;  %s562_s13 = smov 8  }
 0x312   :  { %349 = dma.vmem_to_hbm [thread:$0]  %s344_s4, 256, %s634_s5, [#allocation4], %s561_s12, %s561_s12, %s562_s13  }
 0x313   :  { %551 = dma.done.wait [#allocation4], 256  }
 0x314   :  { %552 = vsyncadd [#allocation4], 4294967040 }
 0x315   :  { %353 = vsyncpa [#allocation3], 1 }
 0x316   :  { %354 = vsyncpa [#allocation6], 1 }
 0x317   :  { %355 = vsyncpa [#allocation4], 1 }

</bundles_post_ra>
